<compile_context>
chip_gen: v7x
topology: tpu7x:2x2x1
jax: 0.10.0
libtpu: 0.0.40
codegen_flags: <defaults>
</compile_context>

<pallas_src>
import jax
import jax.numpy as jnp
from jax import lax
from jax.experimental import pallas as pl
from jax.experimental.pallas import tpu as pltpu


def channel_attn_kernel(gamma_ref, x_ref, out_ref, attn_ref):
    # x_ref block: (TB, C, Np); gamma_ref: (1,) in SMEM.
    xv = x_ref[...]                                         # native dtype (f32/bf16)

    # energy[b] = x[b] @ x[b].T -- contract the lane (Np) dims of both
    # operands directly so no (Np, C) transpose/relayout is materialized;
    # f32 accumulation on the MXU.
    energy = lax.dot_general(
        xv, xv,
        dimension_numbers=(((2,), (2,)), ((0,), (0,))),
        preferred_element_type=jnp.float32,
    )                                                       # (TB, C, C) f32

    # softmax(row_max - energy) == exp(row_min - energy) / sum(exp(row_min - energy))
    # (shift invariance of softmax); single reduction, all exp args <= 0.
    row_min = jnp.min(energy, axis=-1, keepdims=True)       # (TB, C, 1)
    exps = jnp.exp(row_min - energy)                        # (TB, C, C)
    denom = jnp.sum(exps, axis=-1, keepdims=True)           # (TB, C, 1)
    attention = exps * pl.reciprocal(denom, approx=False)   # exact: 1e-5 tol

    # out = gamma * (attention @ x) + x   (batched, contract channel dim)
    av = lax.dot_general(
        attention.astype(xv.dtype), xv,
        dimension_numbers=(((2,), (1,)), ((0,), (0,))),
        preferred_element_type=jnp.float32,
    )                                                       # (TB, C, Np) f32

    gamma = gamma_ref[0]
    out_ref[...] = (gamma * av + xv.astype(jnp.float32)).astype(out_ref.dtype)
    attn_ref[...] = attention.astype(attn_ref.dtype)


def _vmem_capacity_bytes():
    """Physical VMEM per TensorCore (generation-aware), with a safe fallback."""
    try:
        return int(pltpu.get_tpu_info().vmem_capacity_bytes)
    except Exception:
        return 64 * 1024 * 1024          # conservative: v7x per-TC VMEM


def _pick_batch_tile(B, C, Np, itemsize, budget_bytes):
    """Largest divisor TB of B that fits VMEM *and* keeps >= min(B, 4) grid steps.

    Keeping several grid steps preserves BlockSpec software pipelining
    (DMA/compute overlap) and lets v7x's two TensorCores share the batch axis.
    """
    min_steps = min(B, 4)
    max_tb = max(1, B // min_steps)

    # Per-batch-element VMEM estimate: double-buffered x/out blocks in the
    # input dtype, double-buffered f32 attention block, f32 matmul result,
    # and the two live (C, C) f32 temporaries (energy + exps/attention).
    per_b = (
        4 * C * Np * itemsize        # x + out blocks (2 pipeline buffers each)
        + 2 * C * C * 4              # attention block (2 pipeline buffers)
        + C * Np * 4                 # av (f32 matmul result / epilogue)
        + 2 * C * C * 4              # energy + exps/attention temporaries
    )

    for tb in range(max_tb, 0, -1):
        if B % tb == 0 and tb * per_b <= budget_bytes:
            return tb
    return 1


def channel_attn(x_nchw, gamma):
    """x_nchw: (B, C, W, H), gamma: (1,) float32 -> (out_nchw, attention)."""
    B, C, W, H = x_nchw.shape
    N = W * H
    x = x_nchw.reshape(B, C, N)

    # Lane-dense padding of the spatial axis: zero columns contribute nothing
    # to energy = x @ x.T and yield zero columns in attention @ x, so results
    # are unchanged; padded columns are sliced off the output below.
    Np = ((N + 127) // 128) * 128
    if Np != N:
        x = jnp.pad(x, ((0, 0), (0, 0), (0, Np - N)))

    # Generation-aware VMEM budget: ~75% of physical VMEM, capped at 100 MiB.
    # (~96 MiB on v5e/v6e with 128 MiB physical, ~48 MiB on v7x with 64 MiB.)
    vmem_cap = _vmem_capacity_bytes()
    vmem_limit = max(min((vmem_cap * 3) // 4, 100 * 1024 * 1024), 32 * 1024 * 1024)
    budget = max(vmem_limit - 8 * 1024 * 1024, 8 * 1024 * 1024)

    TB = _pick_batch_tile(B, C, Np, x.dtype.itemsize, budget)
    grid = (B // TB,)

    out, attn = pl.pallas_call(
        channel_attn_kernel,
        out_shape=(
            jax.ShapeDtypeStruct((B, C, Np), x.dtype),
            jax.ShapeDtypeStruct((B, C, C), jnp.float32),
        ),
        grid_spec=pltpu.PrefetchScalarGridSpec(
            num_scalar_prefetch=0,
            grid=grid,
            in_specs=[
                pl.BlockSpec(memory_space=pltpu.SMEM),                # gamma
                pl.BlockSpec((TB, C, Np), lambda b: (b, 0, 0)),       # x
            ],
            out_specs=[
                pl.BlockSpec((TB, C, Np), lambda b: (b, 0, 0)),       # out
                pl.BlockSpec((TB, C, C), lambda b: (b, 0, 0)),        # attention
            ],
        ),
        compiler_params=pltpu.CompilerParams(
            dimension_semantics=("parallel",),
            vmem_limit_bytes=vmem_limit,
        ),
    )(gamma, x)

    if Np != N:
        out = out[:, :, :N]
    return out.reshape(B, C, W, H), attn


def channel_attn_ref(x_nchw, gamma):
    """Pure-JAX reference matching the PyTorch module (f32-precision matmuls)."""
    B, C, W, H = x_nchw.shape
    x = x_nchw.reshape(B, C, -1)
    energy = jnp.einsum("bcn,bdn->bcd", x, x, precision=lax.Precision.HIGHEST)
    energy_new = jnp.max(energy, axis=-1, keepdims=True) - energy
    attention = jax.nn.softmax(energy_new, axis=-1)
    out = jnp.einsum("bcd,bdn->bcn", attention, x,
                     precision=lax.Precision.HIGHEST).reshape(B, C, W, H)
    return gamma[0] * out + x_nchw, attention


if __name__ == "__main__":
    key = jax.random.PRNGKey(0)

    # Case 1: N already a multiple of 128, gamma = 0 (module init).
    B, C, W, H = 2, 4, 16, 16
    x = jax.random.normal(key, (B, C, W, H), dtype=jnp.float32)
    gamma = jnp.zeros((1,), dtype=jnp.float32)

    out, attn = channel_attn(x, gamma)
    out = jax.block_until_ready(out)
    attn = jax.block_until_ready(attn)

    out_ref, attn_ref = channel_attn_ref(x, gamma)
    assert out.shape == (B, C, W, H)
    assert attn.shape == (B, C, C)
    assert jnp.allclose(out, out_ref, atol=1e-5, rtol=1e-5)
    assert jnp.allclose(attn, attn_ref, atol=1e-5, rtol=1e-5)

    # Case 2: gamma != 0 (residual + scaled attention output).
    gamma2 = jnp.array([0.5], dtype=jnp.float32)
    out2, attn2 = channel_attn(x, gamma2)
    out2 = jax.block_until_ready(out2)
    out2_ref, attn2_ref = channel_attn_ref(x, gamma2)
    assert jnp.allclose(out2, out2_ref, atol=1e-5, rtol=1e-5)
    assert jnp.allclose(attn2, attn2_ref, atol=1e-5, rtol=1e-5)

    # Case 3: N = 100 (not a multiple of 128) exercises the zero-pad path.
    key2 = jax.random.PRNGKey(0)
    x3 = jax.random.normal(key2, (2, 4, 10, 10), dtype=jnp.float32)
    out3, attn3 = channel_attn(x3, gamma2)
    out3 = jax.block_until_ready(out3)
    out3_ref, attn3_ref = channel_attn_ref(x3, gamma2)
    assert out3.shape == (2, 4, 10, 10)
    assert jnp.allclose(out3, out3_ref, atol=1e-5, rtol=1e-5)
    assert jnp.allclose(attn3, attn3_ref, atol=1e-5, rtol=1e-5)

    print("KERNEL_OK")
</pallas_src>

<mosaic_0001>
module attributes {stable_mosaic.version = 11 : i64} {
  func.func @channel_attn_kernel(%arg0: i32, %arg1: memref<1xf32, #tpu.memory_space<smem>>, %arg2: memref<1x4x256xf32, #tpu.memory_space<vmem>>, %arg3: memref<1x4x256xf32, #tpu.memory_space<vmem>>, %arg4: memref<1x4x4xf32, #tpu.memory_space<vmem>>) attributes {dimension_semantics = [#tpu.dimension_semantics<parallel>], iteration_bounds = array<i64: 2>, scalar_prefetch = 0 : i64, scratch_operands = 0 : i64, tpu.core_type = #tpu.core_type<tc>, window_params = [{transform_indices = @transform_0, window_bounds = array<i64: 1>}, {transform_indices = @transform_1, window_bounds = array<i64: 1, 4, 256>}, {transform_indices = @transform_2, window_bounds = array<i64: 1, 4, 256>}, {transform_indices = @transform_3, window_bounds = array<i64: 1, 4, 4>}]} {
    %c0 = arith.constant 0 : index
    %c0_0 = arith.constant 0 : index
    %c0_1 = arith.constant 0 : index
    %0 = vector.load %arg2[%c0, %c0_0, %c0_1] : memref<1x4x256xf32, #tpu.memory_space<vmem>>, vector<1x4x256xf32>
    %cst = arith.constant dense<0.000000e+00> : vector<1x4x4xf32>
    %1 = tpu.matmul %0, %0, %cst {dimension_numbers = #tpu.dot_dimension_numbers<[2], [2], [1], [1], [0, 0, 0, 1, 1, 1], [0], [0]>} : vector<1x4x256xf32>, vector<1x4x256xf32>, vector<1x4x4xf32> -> vector<1x4x4xf32>
    %cst_2 = arith.constant dense<0x7F800000> : vector<1x4xf32>
    %2 = vector.multi_reduction <minimumf>, %1, %cst_2 [2] : vector<1x4x4xf32> to vector<1x4xf32>
    %3 = vector.shape_cast %2 : vector<1x4xf32> to vector<1x4x1xf32>
    %4 = vector.broadcast %3 : vector<1x4x1xf32> to vector<1x4x4xf32>
    %5 = arith.subf %4, %1 : vector<1x4x4xf32>
    %6 = math.exp %5 : vector<1x4x4xf32>
    %cst_3 = arith.constant dense<0.000000e+00> : vector<1x4xf32>
    %7 = vector.multi_reduction <add>, %6, %cst_3 [2] : vector<1x4x4xf32> to vector<1x4xf32>
    %8 = vector.shape_cast %7 : vector<1x4xf32> to vector<1x4x1xf32>
    %9 = tpu.reciprocal %8 : vector<1x4x1xf32> -> vector<1x4x1xf32>
    %10 = vector.broadcast %9 : vector<1x4x1xf32> to vector<1x4x4xf32>
    %11 = arith.mulf %6, %10 : vector<1x4x4xf32>
    %cst_4 = arith.constant dense<0.000000e+00> : vector<1x4x256xf32>
    %12 = tpu.matmul %11, %0, %cst_4 {dimension_numbers = #tpu.dot_dimension_numbers<[2], [1], [1], [2], [0, 0, 0, 1, 1, 2], [0], [0]>} : vector<1x4x4xf32>, vector<1x4x256xf32>, vector<1x4x256xf32> -> vector<1x4x256xf32>
    %c0_5 = arith.constant 0 : index
    %13 = memref.load %arg1[%c0_5] : memref<1xf32, #tpu.memory_space<smem>>
    %14 = vector.broadcast %13 : f32 to vector<1x4x256xf32>
    %15 = arith.mulf %14, %12 : vector<1x4x256xf32>
    %16 = arith.addf %15, %0 : vector<1x4x256xf32>
    %c0_6 = arith.constant 0 : index
    %c0_7 = arith.constant 0 : index
    %c0_8 = arith.constant 0 : index
    %17 = vector.load %arg3[%c0_6, %c0_7, %c0_8] : memref<1x4x256xf32, #tpu.memory_space<vmem>>, vector<1x4x256xf32>
    tpu.vector_store %arg3[%c0_6, %c0_7, %c0_8], %16 {strides = array<i32>} : memref<1x4x256xf32, #tpu.memory_space<vmem>>, vector<1x4x256xf32>,
    %c0_9 = arith.constant 0 : index
    %c0_10 = arith.constant 0 : index
    %c0_11 = arith.constant 0 : index
    %18 = vector.load %arg4[%c0_9, %c0_10, %c0_11] : memref<1x4x4xf32, #tpu.memory_space<vmem>>, vector<1x4x4xf32>
    tpu.vector_store %arg4[%c0_9, %c0_10, %c0_11], %11 {strides = array<i32>} : memref<1x4x4xf32, #tpu.memory_space<vmem>>, vector<1x4x4xf32>,
    return
  }
  func.func @transform_0(%arg0: i32) -> i32 {
    %c0_i32 = arith.constant 0 : i32
    %c0_i32_0 = arith.constant 0 : i32
    return %c0_i32 : i32
  }
  func.func @transform_1(%arg0: i32) -> (i32, i32, i32) {
    %c0_i32 = arith.constant 0 : i32
    %c0_i32_0 = arith.constant 0 : i32
    %c0_i32_1 = arith.constant 0 : i32
    return %arg0, %c0_i32, %c0_i32_0 : i32, i32, i32
  }
  func.func @transform_2(%arg0: i32) -> (i32, i32, i32) {
    %c0_i32 = arith.constant 0 : i32
    %c0_i32_0 = arith.constant 0 : i32
    %c0_i32_1 = arith.constant 0 : i32
    return %arg0, %c0_i32, %c0_i32_0 : i32, i32, i32
  }
  func.func @transform_3(%arg0: i32) -> (i32, i32, i32) {
    %c0_i32 = arith.constant 0 : i32
    %c0_i32_0 = arith.constant 0 : i32
    %c0_i32_1 = arith.constant 0 : i32
    return %arg0, %c0_i32, %c0_i32_0 : i32, i32, i32
  }
}

</mosaic_0001>

<bundles_post_ra>
// kernel: tpu_custom_call.1
= control target key start
LH: loop header
LB: loop body
LE: loop exit
PB: predicated region body
PF: predicated region fallthrough
CT: control target
= control target key end

     0   :  { %s955_s0 = inlined_call_operand.<no memory space> [shape: f32[1], index: 0, kind: input, shape index: {}]   ;;  %s956_s1 = inlined_call_operand.hbm [shape: f32[2,4,256], index: 1, kind: input, shape index: {}]   ;;  %s957_s2 = inlined_call_operand.hbm [shape: f32[2,4,256], index: 2, kind: output, shape index: {0}]   ;;  %s958_s3 = inlined_call_operand.hbm [shape: f32[2,4,4], index: 3, kind: output, shape index: {1}]  }
   0x1   :  { %9 = sst [smem:[#allocation2]] %s955_s0 }
   0x2   :  { %10 = vsyncpa [#allocation4], 0 }
   0x3   :  { %12 = vsyncpa [#allocation4 + $0x1], 0 }
   0x4   :  { %13 = vsyncpa [#allocation5], 0 }
   0x5   :  { %15 = vsyncpa [#allocation5 + $0x1], 0 }
   0x6   :  { %16 = vsyncpa [#allocation8], 0 }
   0x7   :  { %18 = vsyncpa [#allocation8 + $0x1], 0  ;;  %s748_s14 = smov 0   ;;  %s750_s15 = smov 0  }
   0x8   :  { %s752_s16 = smov 0   ;;  %s754_s17 = smov 0  }
   0x9 LB: > { %s769_s0 = sadd.s32 4294967295, %s719_s17   ;;  %s512_s18 = sadd.s32 4294967294, %s719_s17   ;;  %s719_s17 = sphi %s754_s17, %s973_s17   ;;  %s715_s16 = sphi %s752_s16, %s972_s16   ;;  %s711_s15 = sphi %s750_s15, %s971_s15   ;;  %s707_s14 = sphi %s748_s14, %s970_s14  }
   0xa   : > { %s773_s19 = sadd.s32 1, %s719_s17   ;;  %s52_s20 = sadd.s32 1, %s715_s16 }
   0xb   : > { %s49_s21 = ssub.s32 %s719_s17, %s773_s19  ;;  %p59_p0 = scmp.ne.s32.totalorder %s715_s16, %s711_s15 }
   0xc   : > { %p50_p1 = scmp.eq.s32.totalorder %s49_s21, 0  ;;  %p60_p2 = scmp.eq.s32.totalorder %s719_s17, 0 }
   0xd   : > { %p65_p3 = scmp.ne.s32.totalorder %s711_s15, %s707_s14  ;;  %p66_p4 = scmp.eq.s32.totalorder %s769_s0, 0 }
   0xe   : > { %s785_s22 = scalar_select %p50_p1, %s715_s16, %s52_s20  }
   0xf   : > { %p787_p5 = por %p60_p2, %p59_p0  ;;  %p791_p6 = por %p66_p4, %p65_p3 }
  0x10   : > { %p89_p7 = scmp.eq.s32.totalorder %s769_s0, 1  ;;  %p95_p8 = scmp.eq.s32.totalorder %s512_s18, 1 }
  0x11   : > { %p551_p10 = scmp.lt.s32.totalorder %s719_s17, 2  ;;  %s144_s27 = sand.u32 1, %s715_s16  }
  0x12   : > { %p798_p11 = por %p89_p7, %p59_p0  ;;  %p802_p12 = por %p95_p8, %p65_p3 }
  0x13   : > { %s532_s28 = sshll.u32 %s719_s17, 7  ;;  %s515_s29 = sshll.u32 %s144_s27, 3 }
  0x14   : > { %s962_s25 = scalar_select %p798_p11, 1, 0 }
  0x15   : > { %s963_s26 = scalar_select %p802_p12, 1, 0 }
  0x16   : > { %s811_s5 = scalar_lea.hbm %s956_s1, %s532_s28  ;;  %s148_s6 = scalar_lea.vmem [#allocation3], %s515_s29 }
  0x17   : > { %s156_s7 = sshll.u32 %s148_s6, 4  ;;  %p815_p13 = pnand %p551_p10, %p787_p5  ;;  %s819_s7 = int_to_ptr.vmem [resolvable:$true] %s156_s7 }
  0x18   : > { %s145_s9 = scalar_lea.sflag [#allocation4], %s144_s27  ;;  %s591_s10 = scalar_lea.hbm %s811_s5, 128 }
  0x19   : > { %p592_p2 = scmp.ne.s32.totalorder %s811_s5, %s591_s10  ;;  %p593_p3 = pneg %p815_p13 }
  0x1a   : > { %s596_s13 = scalar_lea.hbm %s956_s1, 256  ;;  %p597_p5 = scmp.lt.u32.totalorder %s811_s5, %s956_s1 }
  0x1b   : > { %p594_p4 = pnand %p593_p3, %p592_p2  ;;  %p598_p8 = scmp.lt.u32.totalorder %s596_s13, %s591_s10 }
  0x1c   : > { %p600_p9 = scmp.lt.u32.totalorder %s591_s10, %s811_s5 }
  0x1d   : > { %p595_p7 = pneg %p594_p4  ;;  %p599_p10 = por %p598_p8, %p597_p5 }
  0x1f   : > { %p601_p0 = por %p600_p9, %p599_p10 }
  0x21   : > { %p602_p1 = pnand %p601_p0, %p595_p7 }
  0x23   : > { %605 = shalt.err (!%p602_p1)
}
  0x24   : > { %s606_s21 = scalar_lea.vmem %s819_s7, 128  ;;  %s721_s23 = smov [#allocation3]  }
  0x25   : > { %p607_p2 = scmp.ne.s32.totalorder %s819_s7, %s606_s21  ;;  %s611_s27 = sshll.u32 %s721_s23, 4  ;;  %s612_s27 = int_to_ptr.vmem [resolvable:$false] %s611_s27 }
  0x26   : > { %s613_s28 = scalar_lea.vmem %s612_s27, 256  ;;  %p614_p11 = scmp.lt.s32.totalorder %s819_s7, %s612_s27 }
  0x27   : > { %p609_p4 = pnand %p607_p2, %p593_p3  ;;  %p615_p5 = scmp.lt.s32.totalorder %s613_s28, %s606_s21 }
  0x29   : > { %p610_p12 = pneg %p609_p4  ;;  %p616_p8 = por %p615_p5, %p614_p11 }
  0x2b   : > { %p617_p9 = pnand %p616_p8, %p610_p12 }
  0x2d   : > { %620 = shalt.err (!%p617_p9)
}
  0x2e   : > { %543 = dma.hbm_to_vmem [thread:$0]  (!%p815_p13), %s811_s5, 128, %s819_s7, %s145_s9  }
  0x2f   : > { %p965_p0 = scmp.lt.s32.totalorder %s719_s17, 3  ;;  %p966_p1 = scmp.ge.s32.totalorder %s719_s17, 1 }
  0x31   : > { %p162_p3 = pnand %p966_p1, %p965_p0 }
  0x32   : > { %s853_s29 = sand.u32 (!%p162_p3), 1, %s711_s15  }
  0x33   : > { %165 = sbr.rel (%p162_p3) target bundleno = 825 (0x339), region = 28  ;;  %s519_s30 = sshll.u32 (!%p162_p3), %s853_s29, 3 }
  0x34   : > { %s168_s4 = scalar_lea.sflag (!%p162_p3), [#allocation4], %s853_s29  ;;  %s171_s6 = scalar_lea.vmem (!%p162_p3), [#allocation3], %s519_s30 }
  0x3a   : > { %694 = dma.done.wait (%p791_p6), %s168_s4, 128  }
  0x3b   : > { %696 = vsyncadd (%p791_p6), %s168_s4, 4294967168  ;;  %v863_v0 = vld [vmem:[%s171_s6] sm:$0xff]  ;;  %vm273_vm0 = vcmask 27648   ;;  %vm289_vm1 = vcmask 1043456   ;;  %v722_v10 = vmov 0.0   ;;  %s521_s24 = sshll.u32 %s853_s29, 2 }
  0x3c   : > { %v867_v1 = vcombine.high %v863_v0, %v863_v0  ;;  %358 = vmatprep.mubr.f32.mxu1 %v722_v10  ;;  %vm285_vm2 = vcmask 31744   ;;  %s198_s5 = scalar_lea.vmem [#allocation7], %s521_s24  ;;  %s529_s7 = sshll.u32 %s769_s0, 6 }
  0x3d   : > { %s410_s8 = sshll.u32 %s198_s5, 4  ;;  %s883_s11 = scalar_lea.hbm %s958_s3, %s529_s7  ;;  %s411_s8 = int_to_ptr.vmem [resolvable:$true] %s410_s8 }
  0x3e   : > { %203 = vmatprep.subr.mxu0 %v867_v1  ;;  %267 = vmatprep.mubr.f32.mxu0 %v867_v1  ;;  %s383_s12 = scalar_lea.sflag [#allocation8], %s853_s29  ;;  %s621_s13 = scalar_lea.vmem %s411_s8, 64 }
  0x3f   : > { %204 = vmatpush1.xpose.msra.mxu0 %v863_v0  ;;  %522 = vmatprep.subr.msk.mxu1 %vm289_vm1, %v867_v1  ;;  %p622_p6 = scmp.ne.s32.totalorder %s411_s8, %s621_s13  ;;  %p967_p11 = scmp.ne.s32.totalorder %s962_s25, 0 }
  0x40   : > { %523 = vmatpush1.msk.msra.mxu1 %vm289_vm1, %v863_v0  ;;  %s723_s18 = smov [#allocation7]  }
  0x41   : > { %p623_p12 = pnand %p622_p6, %p967_p11  ;;  %s625_s20 = sshll.u32 %s723_s18, 4  ;;  %s626_s20 = int_to_ptr.vmem [resolvable:$false] %s625_s20 }
  0x42   : > { %268 = vmatmul.mubr.f32.vlgmr.msra.gmra.mrb[0].mxu0 %v863_v0  ;;  %s627_s21 = scalar_lea.vmem %s626_s20, 128  ;;  %p628_p7 = scmp.lt.s32.totalorder %s411_s8, %s626_s20 }
  0x43   : > { %p624_p13 = pneg %p623_p12  ;;  %p629_p10 = scmp.lt.s32.totalorder %s627_s21, %s621_s13 }
  0x45   : > { %p630_p2 = por %p629_p10, %p628_p7 }
  0x47   : > { %p631_p4 = pnand %p630_p2, %p624_p13 }
 0x115   : > { %v269_v2 = vpop.f32.mrb[0].mxu0 }
 0x116   : > { %v271_v3 = vpop.f32.mrb[1].mxu0  ;;  %v274_v4 = vsel %vm273_vm0, %v269_v2, inf }
 0x117   : > { %275 = vmin.xlane.f32.xlu0 %v274_v4 }
 0x1a4   : > { %v276_v5 = vpop.xlane.xlu0 %275 }
 0x1a5   : > { %v277_v6 = vsub.f32 %v276_v5, %v269_v2 }
 0x1a7   : > { %v278_v7 = vmul.f32 1.442695, %v277_v6 }
 0x1a9   : > { %587 = vpow2.f32 %v278_v7 }
 0x1b3   : > { %v588_v8 = vpop.eup %587 }
 0x1b4   : > { %v280_v9 = vsel %vm273_vm0, %v588_v8, 0.0 }
 0x1b5   : > { %281 = vadd.xlane.f32.xlu0 %v280_v9 }
 0x242   : > { %v282_v11 = vpop.xlane.xlu0 %281 }
 0x243   : > { %589 = vrcp.f32 %v282_v11 }
 0x24d   : > { %v590_v12 = vpop.eup %589 }
 0x24e   : > { %v284_v13 = vmul.f32 %v590_v12, %v588_v8 }
 0x250   : > { %524 = vmatmul.mubr.msk.f32.vlgmr.msra.gmra.mrb[0].mxu1 %vm285_vm2, %v284_v13  ;;  %376 = vst.msk [vmem:[%s198_s5] sm:$0xf] %vm273_vm0, %v284_v13 }
 0x251   : > { %634 = shalt.err (!%p631_p4)
}
 0x252   : > { %s635_s23 = scalar_lea.hbm %s883_s11, 64  ;;  %s639_s4 = scalar_lea.hbm %s958_s3, 128 }
 0x253   : > { %p636_p5 = scmp.ne.s32.totalorder %s883_s11, %s635_s23  ;;  %p640_p0 = scmp.lt.u32.totalorder %s883_s11, %s958_s3 }
 0x254   : > { %p641_p1 = scmp.lt.u32.totalorder %s639_s4, %s635_s23  ;;  %p643_p6 = scmp.lt.u32.totalorder %s635_s23, %s883_s11 }
 0x255   : > { %p637_p8 = pnand %p636_p5, %p967_p11 }
 0x256   : > { %p642_p3 = por %p641_p1, %p640_p0 }
 0x257   : > { %p638_p9 = pneg %p637_p8 }
 0x258   : > { %p644_p12 = por %p643_p6, %p642_p3 }
 0x25a   : > { %p645_p13 = pnand %p644_p12, %p638_p9 }
 0x25c   : > { %648 = shalt.err (!%p645_p13)
}
 0x25d   : > { %537 = dma.vmem_to_hbm [thread:$0]  (%p967_p11), %s411_s8, 64, %s883_s11, %s383_s12  }
 0x25e   : > { %s365_s5 = sld [smem:[#allocation2]]  ;;  %s533_s7 = sshll.u32 %s769_s0, 7 }
 0x25f   : > { %s191_s9 = scalar_lea.vmem [#allocation6], %s519_s30  ;;  %s911_s8 = scalar_lea.hbm %s957_s2, %s533_s7 }
 0x260   : > { %s397_s10 = sshll.u32 %s191_s9, 4  ;;  %s378_s11 = scalar_lea.sflag [#allocation5], %s853_s29  ;;  %s913_s10 = int_to_ptr.vmem [resolvable:$true] %s397_s10 }
 0x261   : > { %s649_s12 = scalar_lea.vmem %s913_s10, 128  ;;  %s724_s0 = smov [#allocation6]  }
 0x262   : > { %p650_p7 = scmp.ne.s32.totalorder %s913_s10, %s649_s12  ;;  %s653_s30 = sshll.u32 %s724_s0, 4  ;;  %s654_s30 = int_to_ptr.vmem [resolvable:$false] %s653_s30 }
 0x263   : > { %s655_s20 = scalar_lea.vmem %s654_s30, 256  ;;  %p656_p4 = scmp.lt.s32.totalorder %s913_s10, %s654_s30 }
 0x264   : > { %v366_v14 = vstv %s365_s5  ;;  %p651_p10 = pnand %p650_p7, %p967_p11  ;;  %p657_p5 = scmp.lt.s32.totalorder %s655_s20, %s649_s12 }
 0x266   : > { %p652_p2 = pneg %p651_p10  ;;  %p658_p8 = por %p657_p5, %p656_p4 }
 0x268   : > { %p659_p9 = pnand %p658_p8, %p652_p2 }
 0x323   : > { %v360_v15 = vpop.f32.mrb[0].mxu1 }
 0x324   : > { %v367_v16 = vmul.f32 %v366_v14, %v360_v15  ;;  %v362_v17 = vpop.f32.mrb[1].mxu1 }
 0x325   : > { %v368_v18 = vmul.f32 %v366_v14, %v362_v17 }
 0x326   : > { %v369_v19 = vadd.f32 %v367_v16, %v863_v0 }
 0x327   : > { %v370_v20 = vadd.f32 %v368_v18, %v867_v1 }
 0x329   : > { %v373_v21 = vcombine.low %v369_v19, %v370_v20 }
 0x32b   : > { %375 = vst [vmem:[%s191_s9] sm:$0xff] %v373_v21 }
 0x32c   : > { %662 = shalt.err (!%p659_p9)
}
 0x32d   : > { %s663_s29 = scalar_lea.hbm %s911_s8, 128  ;;  %s667_s27 = scalar_lea.hbm %s957_s2, 256 }
 0x32e   : > { %p664_p0 = scmp.ne.s32.totalorder %s911_s8, %s663_s29  ;;  %p668_p6 = scmp.lt.u32.totalorder %s911_s8, %s957_s2 }
 0x32f   : > { %p669_p12 = scmp.lt.u32.totalorder %s667_s27, %s663_s29  ;;  %p671_p7 = scmp.lt.u32.totalorder %s663_s29, %s911_s8 }
 0x330   : > { %p665_p1 = pnand %p664_p0, %p967_p11 }
 0x331   : > { %p670_p13 = por %p669_p12, %p668_p6 }
 0x332   : > { %p666_p3 = pneg %p665_p1 }
 0x333   : > { %p672_p10 = por %p671_p7, %p670_p13 }
 0x335   : > { %p673_p2 = pnand %p672_p10, %p666_p3 }
 0x337   : > { %676 = shalt.err (!%p673_p2)
}
 0x338   : > { %536 = dma.vmem_to_hbm [thread:$0]  (%p967_p11), %s913_s10, 128, %s911_s8, %s378_s11  }
 0x339 PF: > { %s422_s6 = sand.u32 1, %s707_s14   ;;  %p968_p4 = scmp.ne.s32.totalorder %s963_s26, 0 }
 0x33a   : > { %p969_p5 = scmp.ge.s32.totalorder %s719_s17, 2  ;;  %s423_s24 = scalar_lea.sflag [#allocation5], %s422_s6 }
 0x33c   : > { %p545_p8 = pnand %p969_p5, %p968_p4 }
 0x33e   : > { %698 = dma.done.wait (!%p545_p8), %s423_s24, 128  }
 0x33f   : > { %700 = vsyncadd (!%p545_p8), %s423_s24, 4294967168  ;;  %s432_s5 = scalar_lea.sflag [#allocation8], %s422_s6 }
 0x340   : > { %702 = dma.done.wait (!%p545_p8), %s432_s5, 64  }
 0x341   : > { %704 = vsyncadd (!%p545_p8), %s432_s5, 4294967232  ;;  %p21_p11 = scmp.ge.s32.totalorder %s773_s19, 4   ;;  %s970_s14 = smov %s711_s15 }
 0x342   : > { %s971_s15 = smov %s715_s16  ;;  %s972_s16 = smov %s785_s22 }
 0x343   : > { %s973_s17 = smov %s773_s19  ;;  %23 = sbr.rel (!%p21_p11) target bundleno = 9 (0x9), region = 90 }
 0x34a   :  { %437 = vsyncpa [#allocation4], 1 }
 0x34b   :  { %439 = vsyncpa [#allocation4 + $0x1], 1 }
 0x34c   :  { %440 = vsyncpa [#allocation5], 1 }
 0x34d   :  { %442 = vsyncpa [#allocation5 + $0x1], 1 }
 0x34e   :  { %443 = vsyncpa [#allocation8], 1 }
 0x34f   :  { %445 = vsyncpa [#allocation8 + $0x1], 1 }

</bundles_post_ra>
